<compile_context>
chip_gen: v6e
topology: v6e:2x2x1
jax: 0.10.0
libtpu: 0.0.40
codegen_flags: <defaults>
</compile_context>

<pallas_src>
import functools

import jax
import jax.numpy as jnp
from jax.experimental import pallas as pl
from jax.experimental.pallas import tpu as pltpu


def _round_up(x, m):
    return ((x + m - 1) // m) * m


def gated_dense_kernel(x_ref, w_ref, b_ref, o_ref, acc_ref, *, tn):
    """Grid = (M_tiles, N_tiles, K_tiles); K is the (arbitrary) reduction axis.

    x_ref:   (tm, tk)        input tile
    w_ref:   (tk, 2*tn)      fused weight tile  [Wh_tile | Wg_tile]
    b_ref:   (1, 2*tn)       fused bias tile (f32)
    o_ref:   (tm, tn)        output tile
    acc_ref: (tm, 2*tn) f32  accumulator scratch (resident across K)
    """
    k = pl.program_id(2)

    @pl.when(k == 0)
    def _():
        acc_ref[...] = jnp.zeros_like(acc_ref)

    # One fused MXU matmul per step covers both the h- and g-projections.
    acc_ref[...] += jnp.dot(x_ref[...], w_ref[...],
                            preferred_element_type=jnp.float32)

    @pl.when(k == pl.num_programs(2) - 1)
    def _():
        hg = acc_ref[...] + b_ref[...]          # f32 epilogue
        h = hg[:, :tn]                          # lane-aligned split (tn % 128 == 0)
        g = jax.nn.sigmoid(hg[:, tn:])
        # TODO(synk): optional `activation` callable on h is None in this config;
        # apply an elementwise jnp op to `h` here if a non-None activation is needed.
        o_ref[...] = (h * g).astype(o_ref.dtype)


def gated_dense(x, wh, bh, wg, bg, *, tm=None, tn=None, tk=None):
    """x: [B, D_in]; wh, wg: [D_in, D_out]; bh, bg: [D_out] -> out: [B, D_out].

    Weights use the y = x @ W + b convention ([D_in, D_out], i.e. transpose of
    PyTorch nn.Linear's [out, in]).
    """
    B, D_in = x.shape
    D_out = wh.shape[1]

    # --- pad to hardware-friendly multiples (sublane=8, lane=128) ------------
    B_p = _round_up(B, 8)
    K_p = _round_up(D_in, 128)
    N_p = _round_up(D_out, 128)

    # Tile sizes: sized well under the v7x 32 MiB default-scoped VMEM budget
    # (x, weight double-buffers + f32 accumulator + output tile ~ a few MiB).
    if tm is None:
        tm = min(256, B_p)
    if tk is None:
        tk = min(512, K_p)
    if tn is None:
        tn = min(256, N_p)          # always a multiple of 128 -> lane-dense stores

    B_p = _round_up(B_p, tm)
    K_p = _round_up(K_p, tk)
    N_p = _round_up(N_p, tn)
    n_tiles = N_p // tn

    x_p = jnp.pad(x, ((0, B_p - B), (0, K_p - D_in)))
    wh_p = jnp.pad(wh, ((0, K_p - D_in), (0, N_p - D_out)))
    wg_p = jnp.pad(wg, ((0, K_p - D_in), (0, N_p - D_out)))
    bh_p = jnp.pad(bh, (0, N_p - D_out))
    bg_p = jnp.pad(bg, (0, N_p - D_out))

    # --- fuse Wh/Wg per N-tile: columns [j*2*tn : j*2*tn+tn] = Wh_j, rest = Wg_j
    w_fused = jnp.stack(
        [wh_p.reshape(K_p, n_tiles, tn), wg_p.reshape(K_p, n_tiles, tn)], axis=2
    ).reshape(K_p, 2 * N_p)
    b_fused = jnp.stack(
        [bh_p.reshape(n_tiles, tn), bg_p.reshape(n_tiles, tn)], axis=1
    ).reshape(1, 2 * N_p).astype(jnp.float32)   # keep bias/epilogue math in f32

    grid = (B_p // tm, N_p // tn, K_p // tk)

    itemsize = jnp.dtype(x.dtype).itemsize
    cost = pl.CostEstimate(
        flops=2 * 2 * B * D_in * D_out,          # two projections
        transcendentals=B * D_out,               # sigmoid
        bytes_accessed=(B * D_in + 2 * D_in * D_out + 2 * D_out + B * D_out)
        * itemsize,
    )

    out_p = pl.pallas_call(
        functools.partial(gated_dense_kernel, tn=tn),
        out_shape=jax.ShapeDtypeStruct((B_p, N_p), x.dtype),
        grid_spec=pltpu.PrefetchScalarGridSpec(
            num_scalar_prefetch=0,
            grid=grid,
            in_specs=[
                pl.BlockSpec((tm, tk), lambda i, j, k: (i, k)),
                # NOTE: if weight DMA is still exposed on v6e (small B), bump this
                # spec to pipeline_mode=pl.Buffered(3).
                pl.BlockSpec((tk, 2 * tn), lambda i, j, k: (k, j)),
                pl.BlockSpec((1, 2 * tn), lambda i, j, k: (0, j)),
            ],
            out_specs=pl.BlockSpec((tm, tn), lambda i, j, k: (i, j)),
            scratch_shapes=[pltpu.VMEM((tm, 2 * tn), jnp.float32)],
        ),
        compiler_params=pltpu.CompilerParams(
            dimension_semantics=("parallel", "parallel", "arbitrary"),
        ),
        cost_estimate=cost,
    )(x_p, w_fused, b_fused)

    return out_p[:B, :D_out]


def gated_dense_ref(x, wh, bh, wg, bg):
    h = x @ wh + bh
    g = jax.nn.sigmoid(x @ wg + bg)
    return h * g


def _make_inputs(key, B, D_in, D_out):
    kx, kwh, kbh, kwg, kbg = jax.random.split(key, 5)
    bound = 1.0 / (D_in ** 0.5)        # nn.Linear default init scale
    x = jax.random.normal(kx, (B, D_in), dtype=jnp.float32)
    wh = jax.random.uniform(kwh, (D_in, D_out), jnp.float32, -bound, bound)
    bh = jax.random.uniform(kbh, (D_out,), jnp.float32, -bound, bound)
    wg = jax.random.uniform(kwg, (D_in, D_out), jnp.float32, -bound, bound)
    bg = jax.random.uniform(kbg, (D_out,), jnp.float32, -bound, bound)
    return x, wh, bh, wg, bg


if __name__ == "__main__":
    key = jax.random.PRNGKey(0)
    k1, k2 = jax.random.split(key)

    # Case 1: small, non-aligned shapes -> exercises padding + lane-dense tiling.
    B, D_in, D_out = 8, 96, 160
    x, wh, bh, wg, bg = _make_inputs(k1, B, D_in, D_out)
    out = gated_dense(x, wh, bh, wg, bg)
    jax.block_until_ready(out)
    ref = gated_dense_ref(x, wh, bh, wg, bg)
    assert out.shape == (B, D_out)
    assert jnp.allclose(out, ref, atol=1e-4, rtol=1e-4), "case 1 mismatch"

    # Case 2: multi-tile grid (2,2,2) -> exercises K accumulation + N/M tiling.
    B, D_in, D_out = 16, 256, 256
    x, wh, bh, wg, bg = _make_inputs(k2, B, D_in, D_out)
    out = gated_dense(x, wh, bh, wg, bg, tm=8, tn=128, tk=128)
    jax.block_until_ready(out)
    ref = gated_dense_ref(x, wh, bh, wg, bg)
    assert out.shape == (B, D_out)
    assert jnp.allclose(out, ref, atol=1e-4, rtol=1e-4), "case 2 mismatch"

    print("KERNEL_OK")
</pallas_src>

<mosaic_0001>
module attributes {stable_mosaic.version = 11 : i64} {
  func.func @gated_dense_kernel(%arg0: i32, %arg1: i32, %arg2: i32, %arg3: memref<8x128xf32, #tpu.memory_space<vmem>>, %arg4: memref<128x512xf32, #tpu.memory_space<vmem>>, %arg5: memref<1x512xf32, #tpu.memory_space<vmem>>, %arg6: memref<8x256xf32, #tpu.memory_space<vmem>>, %arg7: memref<8x512xf32, #tpu.memory_space<vmem>>) attributes {dimension_semantics = [#tpu.dimension_semantics<parallel>, #tpu.dimension_semantics<parallel>, #tpu.dimension_semantics<arbitrary>], iteration_bounds = array<i64: 1, 1, 1>, scalar_prefetch = 0 : i64, scratch_operands = 1 : i64, tpu.core_type = #tpu.core_type<tc>, window_params = [{transform_indices = @transform_0, window_bounds = array<i64: 8, 128>}, {transform_indices = @transform_1, window_bounds = array<i64: 128, 512>}, {transform_indices = @transform_2, window_bounds = array<i64: 1, 512>}, {transform_indices = @transform_3, window_bounds = array<i64: 8, 256>}]} {
    %c0_i32 = arith.constant 0 : i32
    %0 = arith.cmpi eq, %arg2, %c0_i32 : i32
    %1 = arith.extui %0 : i1 to i32
    %c0_i32_0 = arith.constant 0 : i32
    %2 = arith.cmpi ne, %1, %c0_i32_0 : i32
    scf.if %2 {
      %cst_10 = arith.constant 0.000000e+00 : f32
      %12 = vector.broadcast %cst_10 : f32 to vector<8x512xf32>
      %c0_11 = arith.constant 0 : index
      %c0_12 = arith.constant 0 : index
      %13 = vector.load %arg7[%c0_11, %c0_12] : memref<8x512xf32, #tpu.memory_space<vmem>>, vector<8x512xf32>
      tpu.vector_store %arg7[%c0_11, %c0_12], %12 {strides = array<i32>} : memref<8x512xf32, #tpu.memory_space<vmem>>, vector<8x512xf32>,
    } else {
    }
    %c0 = arith.constant 0 : index
    %c0_1 = arith.constant 0 : index
    %3 = vector.load %arg7[%c0, %c0_1] : memref<8x512xf32, #tpu.memory_space<vmem>>, vector<8x512xf32>
    %c0_2 = arith.constant 0 : index
    %c0_3 = arith.constant 0 : index
    %4 = vector.load %arg3[%c0_2, %c0_3] : memref<8x128xf32, #tpu.memory_space<vmem>>, vector<8x128xf32>
    %c0_4 = arith.constant 0 : index
    %c0_5 = arith.constant 0 : index
    %5 = vector.load %arg4[%c0_4, %c0_5] : memref<128x512xf32, #tpu.memory_space<vmem>>, vector<128x512xf32>
    %cst = arith.constant dense<0.000000e+00> : vector<8x512xf32>
    %6 = tpu.matmul %4, %5, %cst {dimension_numbers = #tpu.dot_dimension_numbers<[1], [0], [0], [1], [0, 0, 1, 1], [], []>} : vector<8x128xf32>, vector<128x512xf32>, vector<8x512xf32> -> vector<8x512xf32>
    %7 = arith.addf %3, %6 : vector<8x512xf32>
    %c0_6 = arith.constant 0 : index
    %c0_7 = arith.constant 0 : index
    %8 = vector.load %arg7[%c0_6, %c0_7] : memref<8x512xf32, #tpu.memory_space<vmem>>, vector<8x512xf32>
    tpu.vector_store %arg7[%c0_6, %c0_7], %7 {strides = array<i32>} : memref<8x512xf32, #tpu.memory_space<vmem>>, vector<8x512xf32>,
    %c0_i32_8 = arith.constant 0 : i32
    %9 = arith.cmpi eq, %arg2, %c0_i32_8 : i32
    %10 = arith.extui %9 : i1 to i32
    %c0_i32_9 = arith.constant 0 : i32
    %11 = arith.cmpi ne, %10, %c0_i32_9 : i32
    scf.if %11 {
      %c0_10 = arith.constant 0 : index
      %c0_11 = arith.constant 0 : index
      %12 = vector.load %arg7[%c0_10, %c0_11] : memref<8x512xf32, #tpu.memory_space<vmem>>, vector<8x512xf32>
      %c0_12 = arith.constant 0 : index
      %c0_13 = arith.constant 0 : index
      %13 = vector.load %arg5[%c0_12, %c0_13] : memref<1x512xf32, #tpu.memory_space<vmem>>, vector<1x512xf32>
      %14 = vector.broadcast %13 : vector<1x512xf32> to vector<8x512xf32>
      %15 = arith.addf %12, %14 : vector<8x512xf32>
      %16 = vector.extract_strided_slice %15 {offsets = [0, 0], sizes = [8, 256], strides = [1, 1]} : vector<8x512xf32> to vector<8x256xf32>
      %17 = vector.extract_strided_slice %15 {offsets = [0, 256], sizes = [8, 256], strides = [1, 1]} : vector<8x512xf32> to vector<8x256xf32>
      %18 = arith.negf %17 : vector<8x256xf32>
      %19 = math.exp %18 : vector<8x256xf32>
      %cst_14 = arith.constant 1.000000e+00 : f32
      %20 = vector.broadcast %cst_14 : f32 to vector<8x256xf32>
      %21 = arith.addf %20, %19 : vector<8x256xf32>
      %22 = arith.divf %20, %21 : vector<8x256xf32>
      %23 = arith.mulf %16, %22 : vector<8x256xf32>
      %c0_15 = arith.constant 0 : index
      %c0_16 = arith.constant 0 : index
      %24 = vector.load %arg6[%c0_15, %c0_16] : memref<8x256xf32, #tpu.memory_space<vmem>>, vector<8x256xf32>
      tpu.vector_store %arg6[%c0_15, %c0_16], %23 {strides = array<i32>} : memref<8x256xf32, #tpu.memory_space<vmem>>, vector<8x256xf32>,
    } else {
    }
    return
  }
  func.func @transform_0(%arg0: i32, %arg1: i32, %arg2: i32) -> (i32, i32) {
    %c0_i32 = arith.constant 0 : i32
    return %arg0, %arg2 : i32, i32
  }
  func.func @transform_1(%arg0: i32, %arg1: i32, %arg2: i32) -> (i32, i32) {
    %c0_i32 = arith.constant 0 : i32
    return %arg2, %arg1 : i32, i32
  }
  func.func @transform_2(%arg0: i32, %arg1: i32, %arg2: i32) -> (i32, i32) {
    %c0_i32 = arith.constant 0 : i32
    %c0_i32_0 = arith.constant 0 : i32
    return %c0_i32, %arg1 : i32, i32
  }
  func.func @transform_3(%arg0: i32, %arg1: i32, %arg2: i32) -> (i32, i32) {
    %c0_i32 = arith.constant 0 : i32
    return %arg0, %arg1 : i32, i32
  }
}

</mosaic_0001>

<bundles_post_ra>
// kernel: tpu_custom_call.1
= control target key start
LH: loop header
LB: loop body
LE: loop exit
PB: predicated region body
PF: predicated region fallthrough
CT: control target
= control target key end

     0   :  { %8 = vsyncpa [#allocation4], 0  ;;  %s486_s0 = inlined_call_operand.hbm [shape: f32[8,128], index: 0, kind: input, shape index: {}]   ;;  %s487_s1 = inlined_call_operand.hbm [shape: f32[128,512], index: 1, kind: input, shape index: {}]   ;;  %s488_s2 = inlined_call_operand.hbm [shape: f32[1,512], index: 2, kind: input, shape index: {}]   ;;  %s489_s3 = inlined_call_operand.hbm [shape: f32[8,256], index: 3, kind: output, shape index: {}]  }
   0x1   :  { %9 = vsyncpa [#allocation7], 0 }
   0x2   :  { %10 = vsyncpa [#allocation5], 0  ;;  %s447_s12 = smov [#allocation6]  }
   0x3   :  { %s26_s13 = sshll.u32 %s447_s12, 4  ;;  %s27_s13 = int_to_ptr.vmem [resolvable:$true] %s26_s13 }
   0x4   :  { %s369_s14 = scalar_lea.vmem %s27_s13, 8192  ;;  %p374_p1 = scmp.lt.s32.totalorder %s27_s13, %s27_s13 }
   0x5   :  { %p370_p0 = scmp.ne.s32.totalorder %s27_s13, %s369_s14  ;;  %p375_p2 = scmp.lt.s32.totalorder %s369_s14, %s369_s14 }
   0x7   :  { %p376_p3 = por %p375_p2, %p374_p1 }
   0x9   :  { %p377_p4 = pnand %p376_p3, %p370_p0 }
   0xb   :  { %380 = shalt.err (!%p377_p4)
}
   0xc   :  { %s448_s15 = smov 512   ;;  %s449_s16 = smov 32  }
   0xd   :  { %32 = dma.hbm_to_vmem [thread:$0]  %s487_s1, 8192, %s27_s13, [#allocation7], %s448_s15, %s448_s15, %s449_s16  }
   0xe   :  { %s450_s19 = smov [#allocation3]   ;;  %s451_s21 = smov [#allocation8]  }
   0xf   :  { %s17_s20 = sshll.u32 %s450_s19, 4  ;;  %s39_s22 = sshll.u32 %s451_s21, 4  ;;  %s18_s20 = int_to_ptr.vmem [resolvable:$true] %s17_s20  ;;  %s40_s22 = int_to_ptr.vmem [resolvable:$true] %s39_s22 }
  0x10   :  { %s389_s23 = scalar_lea.vmem %s18_s20, 128  ;;  %p394_p6 = scmp.lt.s32.totalorder %s18_s20, %s18_s20 }
  0x11   :  { %p390_p5 = scmp.ne.s32.totalorder %s18_s20, %s389_s23  ;;  %p395_p7 = scmp.lt.s32.totalorder %s389_s23, %s389_s23 }
  0x13   :  { %p396_p8 = por %p395_p7, %p394_p6 }
  0x15   :  { %p397_p9 = pnand %p396_p8, %p390_p5 }
  0x17   :  { %400 = shalt.err (!%p397_p9)
}
  0x18   :  { %20 = dma.hbm_to_vmem [thread:$0]  %s486_s0, 128, %s18_s20, [#allocation4]  }
  0x19   :  { %s409_s26 = scalar_lea.vmem %s40_s22, 64  ;;  %p414_p11 = scmp.lt.s32.totalorder %s40_s22, %s40_s22 }
  0x1a   :  { %p410_p10 = scmp.ne.s32.totalorder %s40_s22, %s409_s26  ;;  %p415_p12 = scmp.lt.s32.totalorder %s409_s26, %s409_s26 }
  0x1c   :  { %p416_p13 = por %p415_p12, %p414_p11 }
  0x1e   :  { %p417_p0 = pnand %p416_p13, %p410_p10 }
  0x20   :  { %420 = shalt.err (!%p417_p0)
}
  0x21   :  { %42 = dma.hbm_to_vmem [thread:$0]  %s488_s2, 64, %s40_s22, [#allocation7]  }
  0x22   :  { %441 = dma.done.wait [#allocation4], 128  }
  0x23   :  { %442 = vsyncadd [#allocation4], 4294967168 }
  0x24   :  { %443 = dma.done.wait [#allocation7], 8256  }
  0x25   :  { %444 = vsyncadd [#allocation7], 4294959040  ;;  %v452_v0 = vmov 0.0   ;;  %v128_v1 = vld [vmem:[#allocation6 + $0x1f8] sm:$0xff]  ;;  %v127_v2 = vld [vmem:[#allocation6 + $0x1f0] sm:$0xff]  ;;  %s453_s0 = smov [#allocation9]  }
  0x26   :  { %264 = vmatprep.mubr.f32.mxu1 %v452_v0  ;;  %193 = vmatprep.mubr.f32.mxu0 %v452_v0  ;;  %v124_v3 = vld [vmem:[#allocation6 + $0x1d8] sm:$0xff]  ;;  %v123_v4 = vld [vmem:[#allocation6 + $0x1d0] sm:$0xff]  ;;  %v126_v14 = vld [vmem:[#allocation6 + $0x1e8] sm:$0xff]  ;;  %s334_s2 = sshll.u32 %s453_s0, 4  ;;  %s335_s2 = int_to_ptr.vmem [resolvable:$true] %s334_s2 }
  0x27   :  { %200 = vmatprep.subr.mxu1 %v128_v1  ;;  %v120_v5 = vld [vmem:[#allocation6 + $0x1b8] sm:$0xff]  ;;  %v119_v6 = vld [vmem:[#allocation6 + $0x1b0] sm:$0xff]  ;;  %v125_v15 = vld [vmem:[#allocation6 + $0x1e0] sm:$0xff]  ;;  %129 = vmatprep.subr.mxu0 %v126_v14  ;;  %s421_s28 = scalar_lea.vmem %s335_s2, 256  ;;  %p426_p2 = scmp.lt.s32.totalorder %s335_s2, %s335_s2 }
  0x28   :  { %201 = vmatpush1.msra.mxu1 %v127_v2  ;;  %v116_v7 = vld [vmem:[#allocation6 + $0x198] sm:$0xff]  ;;  %v115_v8 = vld [vmem:[#allocation6 + $0x190] sm:$0xff]  ;;  %v122_v17 = vld [vmem:[#allocation6 + $0x1c8] sm:$0xff]  ;;  %130 = vmatpush1.msra.mxu0 %v125_v15  ;;  %v288_v2 = vlaneseq  ;;  %p422_p1 = scmp.ne.s32.totalorder %s335_s2, %s421_s28  ;;  %p427_p3 = scmp.lt.s32.totalorder %s421_s28, %s421_s28 }
  0x29   :  { %202 = vmatprep.subr.mxu1 %v124_v3  ;;  %v112_v9 = vld [vmem:[#allocation6 + $0x178] sm:$0xff]  ;;  %v111_v10 = vld [vmem:[#allocation6 + $0x170] sm:$0xff]  ;;  %v121_v19 = vld [vmem:[#allocation6 + $0x1c0] sm:$0xff]  ;;  %131 = vmatprep.subr.mxu0 %v122_v17 }
  0x2a   :  { %203 = vmatpush1.msra.mxu1 %v123_v4  ;;  %v108_v11 = vld [vmem:[#allocation6 + $0x158] sm:$0xff]  ;;  %v107_v12 = vld [vmem:[#allocation6 + $0x150] sm:$0xff]  ;;  %v118_v20 = vld [vmem:[#allocation6 + $0x1a8] sm:$0xff]  ;;  %132 = vmatpush1.msra.mxu0 %v121_v19  ;;  %v289_v3 = vshrl.u32 %v288_v2, 7  ;;  %p428_p4 = por %p427_p3, %p426_p2 }
  0x2b   :  { %204 = vmatprep.subr.mxu1 %v120_v5  ;;  %v104_v13 = vld [vmem:[#allocation6 + $0x138] sm:$0xff]  ;;  %v103_v16 = vld [vmem:[#allocation6 + $0x130] sm:$0xff]  ;;  %v117_v22 = vld [vmem:[#allocation6 + $0x1a0] sm:$0xff]  ;;  %133 = vmatprep.subr.mxu0 %v118_v20 }
  0x2c   :  { %205 = vmatpush1.msra.mxu1 %v119_v6  ;;  %v100_v18 = vld [vmem:[#allocation6 + $0x118] sm:$0xff]  ;;  %v99_v21 = vld [vmem:[#allocation6 + $0x110] sm:$0xff]  ;;  %v114_v24 = vld [vmem:[#allocation6 + $0x188] sm:$0xff]  ;;  %134 = vmatpush1.msra.mxu0 %v117_v22  ;;  %v298_v4 = vsub.s32 2, %v289_v3  ;;  %v302_v6 = vsub.s32 3, %v289_v3  ;;  %v290_v19 = vsub.s32 0, %v289_v3  ;;  %p429_p5 = pnand %p428_p4, %p422_p1 }
  0x2d   :  { %206 = vmatprep.subr.mxu1 %v116_v7  ;;  %v96_v23 = vld [vmem:[#allocation6 + $0xf8] sm:$0xff]  ;;  %v95_v25 = vld [vmem:[#allocation6 + $0xf0] sm:$0xff]  ;;  %v113_v26 = vld [vmem:[#allocation6 + $0x180] sm:$0xff]  ;;  %135 = vmatprep.subr.mxu0 %v114_v24 }
  0x2e   :  { %207 = vmatpush1.msra.mxu1 %v115_v8  ;;  %v92_v27 = vld [vmem:[#allocation6 + $0xd8] sm:$0xff]  ;;  %v110_v28 = vld [vmem:[#allocation6 + $0x168] sm:$0xff]  ;;  %v91_v29 = vld [vmem:[#allocation6 + $0xd0] sm:$0xff]  ;;  %136 = vmatpush1.msra.mxu0 %v113_v26 }
  0x2f   :  { %208 = vmatprep.subr.mxu1 %v112_v9  ;;  %v109_v30 = vld [vmem:[#allocation6 + $0x160] sm:$0xff]  ;;  %v88_v31 = vld [vmem:[#allocation6 + $0xb8] sm:$0xff]  ;;  %v106_v32 = vld [vmem:[#allocation6 + $0x148] sm:$0xff]  ;;  %137 = vmatprep.subr.mxu0 %v110_v28 }
  0x30   :  { %209 = vmatpush1.msra.mxu1 %v111_v10  ;;  %v87_v33 = vld [vmem:[#allocation6 + $0xb0] sm:$0xff]  ;;  %v105_v34 = vld [vmem:[#allocation6 + $0x140] sm:$0xff]  ;;  %v84_v35 = vld [vmem:[#allocation6 + $0x98] sm:$0xff]  ;;  %138 = vmatpush1.msra.mxu0 %v109_v30 }
  0x31   :  { %210 = vmatprep.subr.mxu1 %v108_v11  ;;  %v102_v36 = vld [vmem:[#allocation6 + $0x128] sm:$0xff]  ;;  %v83_v37 = vld [vmem:[#allocation6 + $0x90] sm:$0xff]  ;;  %139 = vmatprep.subr.mxu0 %v106_v32  ;;  %v101_v38 = vld [vmem:[#allocation6 + $0x120] sm:$0xff] }
  0x32   :  { %211 = vmatpush1.msra.mxu1 %v107_v12  ;;  %v80_v39 = vld [vmem:[#allocation6 + $0x78] sm:$0xff]  ;;  %140 = vmatpush1.msra.mxu0 %v105_v34  ;;  %v98_v40 = vld [vmem:[#allocation6 + $0x108] sm:$0xff]  ;;  %v79_v41 = vld [vmem:[#allocation6 + $0x70] sm:$0xff] }
  0x33   :  { %212 = vmatprep.subr.mxu1 %v104_v13  ;;  %141 = vmatprep.subr.mxu0 %v102_v36  ;;  %v97_v42 = vld [vmem:[#allocation6 + $0x100] sm:$0xff]  ;;  %v76_v43 = vld [vmem:[#allocation6 + $0x58] sm:$0xff]  ;;  %v94_v44 = vld [vmem:[#allocation6 + $0xe8] sm:$0xff] }
  0x34   :  { %213 = vmatpush1.msra.mxu1 %v103_v16  ;;  %142 = vmatpush1.msra.mxu0 %v101_v38  ;;  %v75_v45 = vld [vmem:[#allocation6 + $0x50] sm:$0xff]  ;;  %v93_v46 = vld [vmem:[#allocation6 + $0xe0] sm:$0xff]  ;;  %v72_v47 = vld [vmem:[#allocation6 + $0x38] sm:$0xff] }
  0x35   :  { %214 = vmatprep.subr.mxu1 %v100_v18  ;;  %143 = vmatprep.subr.mxu0 %v98_v40  ;;  %v90_v48 = vld [vmem:[#allocation6 + $0xc8] sm:$0xff]  ;;  %v71_v49 = vld [vmem:[#allocation6 + $0x30] sm:$0xff]  ;;  %v89_v50 = vld [vmem:[#allocation6 + $0xc0] sm:$0xff] }
  0x36   :  { %215 = vmatpush1.msra.mxu1 %v99_v21  ;;  %144 = vmatpush1.msra.mxu0 %v97_v42  ;;  %v68_v51 = vld [vmem:[#allocation6 + $0x18] sm:$0xff]  ;;  %v86_v52 = vld [vmem:[#allocation6 + $0xa8] sm:$0xff]  ;;  %v67_v53 = vld [vmem:[#allocation6 + $0x10] sm:$0xff]  ;;  %v294_v21 = vsub.s32 1, %v289_v3 }
  0x37   :  { %216 = vmatprep.subr.mxu1 %v96_v23  ;;  %145 = vmatprep.subr.mxu0 %v94_v44  ;;  %v85_v54 = vld [vmem:[#allocation6 + $0xa0] sm:$0xff]  ;;  %v64_v55 = vld [vmem:[#allocation3] sm:$0xff]  ;;  %v82_v56 = vld [vmem:[#allocation6 + $0x88] sm:$0xff] }
  0x38   :  { %217 = vmatpush1.msra.mxu1 %v95_v25  ;;  %146 = vmatpush1.msra.mxu0 %v93_v46  ;;  %v81_v57 = vld [vmem:[#allocation6 + $0x80] sm:$0xff]  ;;  %v78_v58 = vld [vmem:[#allocation6 + $0x68] sm:$0xff] }
  0x39   :  { %218 = vmatprep.subr.mxu1 %v92_v27  ;;  %147 = vmatprep.subr.mxu0 %v90_v48  ;;  %v77_v59 = vld [vmem:[#allocation6 + $0x60] sm:$0xff]  ;;  %v74_v60 = vld [vmem:[#allocation6 + $0x48] sm:$0xff] }
  0x3a   :  { %219 = vmatpush1.msra.mxu1 %v91_v29  ;;  %148 = vmatpush1.msra.mxu0 %v89_v50  ;;  %v73_v61 = vld [vmem:[#allocation6 + $0x40] sm:$0xff]  ;;  %v70_v62 = vld [vmem:[#allocation6 + $0x28] sm:$0xff] }
  0x3b   :  { %220 = vmatprep.subr.mxu1 %v88_v31  ;;  %149 = vmatprep.subr.mxu0 %v86_v52  ;;  %v69_v63 = vld [vmem:[#allocation6 + $0x20] sm:$0xff]  ;;  %v66_v0 = vld [vmem:[#allocation6 + $0x8] sm:$0xff] }
  0x3c   :  { %221 = vmatpush1.msra.mxu1 %v87_v33  ;;  %150 = vmatpush1.msra.mxu0 %v85_v54  ;;  %v65_v1 = vld [vmem:[#allocation6] sm:$0xff] }
  0x3d   :  { %222 = vmatprep.subr.mxu1 %v84_v35  ;;  %151 = vmatprep.subr.mxu0 %v82_v56  ;;  %v286_v5 = vld [vmem:[#allocation8] sm:$0xf] }
  0x3e   :  { %223 = vmatpush1.msra.mxu1 %v83_v37  ;;  %152 = vmatpush1.msra.mxu0 %v81_v57  ;;  %v299_v7 = vrot.slane %v286_v5, %v298_v4  ;;  %v303_v8 = vrot.slane %v286_v5, %v302_v6  ;;  %v291_v20 = vrot.slane %v286_v5, %v290_v19 }
  0x3f   :  { %224 = vmatprep.subr.mxu1 %v80_v39  ;;  %153 = vmatprep.subr.mxu0 %v78_v58  ;;  %v295_v24 = vrot.slane %v286_v5, %v294_v21 }
  0x40   :  { %225 = vmatpush1.msra.mxu1 %v79_v41  ;;  %154 = vmatpush1.msra.mxu0 %v77_v59 }
  0x41   :  { %226 = vmatprep.subr.mxu1 %v76_v43  ;;  %155 = vmatprep.subr.mxu0 %v74_v60 }
  0x42   :  { %227 = vmatpush1.msra.mxu1 %v75_v45  ;;  %156 = vmatpush1.msra.mxu0 %v73_v61 }
  0x43   :  { %228 = vmatprep.subr.mxu1 %v72_v47  ;;  %157 = vmatprep.subr.mxu0 %v70_v62 }
  0x44   :  { %229 = vmatpush1.msra.mxu1 %v71_v49  ;;  %158 = vmatpush1.msra.mxu0 %v69_v63 }
  0x45   :  { %230 = vmatprep.subr.mxu1 %v68_v51  ;;  %159 = vmatprep.subr.mxu0 %v66_v0 }
  0x46   :  { %231 = vmatpush1.msra.mxu1 %v67_v53  ;;  %160 = vmatpush1.msra.mxu0 %v65_v1 }
  0x47   :  { %265 = vmatmul.mubr.f32.vlgmr.msra.gmra.mxu1 %v64_v55  ;;  %194 = vmatmul.mubr.f32.vlgmr.msra.gmra.mxu0 %v64_v55 }
 0x107   :  { %v266_v9 = vpop.f32.mrf.mxu1  ;;  %v195_v22 = vpop.f32.mrf.mxu0 }
 0x108   :  { %v310_v10 = vadd.f32 %v299_v7, %v266_v9  ;;  %v308_v23 = vadd.f32 %v291_v20, %v195_v22 }
 0x109   :  { %v268_v11 = vpop.f32.mrf.mxu1  ;;  %v197_v25 = vpop.f32.mrf.mxu0 }
 0x10a   :  { %v344_v12 = vmul.f32 -1.442695, %v310_v10  ;;  %v311_v13 = vadd.f32 %v303_v8, %v268_v11  ;;  %v309_v28 = vadd.f32 %v295_v24, %v197_v25 }
 0x10c   :  { %353 = vpow2.f32 %v344_v12  ;;  %v345_v14 = vmul.f32 -1.442695, %v311_v13 }
 0x10e   :  { %355 = vpow2.f32 %v345_v14 }
 0x119   :  { %v354_v15 = vpop.eup %353 }
 0x11a   :  { %v318_v16 = vadd.f32 1.0, %v354_v15 }
 0x11b   :  { %v356_v17 = vpop.eup %355 }
 0x11c   :  { %357 = vrcp.f32 %v318_v16  ;;  %v319_v18 = vadd.f32 1.0, %v356_v17 }
 0x11e   :  { %359 = vrcp.f32 %v319_v18 }
 0x129   :  { %v358_v26 = vpop.eup %357 }
 0x12a   :  { %v324_v27 = vmul.f32 %v358_v26, %v308_v23 }
 0x12b   :  { %v360_v29 = vpop.eup %359 }
 0x12c   :  { %326 = vst [vmem:[#allocation9] sm:$0xff] %v324_v27  ;;  %v325_v30 = vmul.f32 %v360_v29, %v309_v28 }
 0x12e   :  { %327 = vst [vmem:[#allocation9 + $0x8] sm:$0xff] %v325_v30 }
 0x12f   :  { %432 = shalt.err (!%p429_p5)
}
 0x130   :  { %337 = dma.vmem_to_hbm [thread:$0]  %s335_s2, 256, %s489_s3, [#allocation5]  }
 0x131   :  { %445 = dma.done.wait [#allocation5], 256  }
 0x132   :  { %446 = vsyncadd [#allocation5], 4294967040 }
 0x133   :  { %341 = vsyncpa [#allocation4], 1 }
 0x134   :  { %342 = vsyncpa [#allocation7], 1 }
 0x135   :  { %343 = vsyncpa [#allocation5], 1 }

</bundles_post_ra>
